<compile_context>
chip_gen: v6e
topology: v6e:2x2x1
jax: 0.10.0
libtpu: 0.0.40
codegen_flags: <defaults>
</compile_context>

<pallas_src>
import jax
import jax.numpy as jnp
from jax.experimental import pallas as pl
from jax.experimental.pallas import tpu as pltpu

# Module constants (small, deterministic synthetic configuration)
N_SLICES = 6
N_SIDES = 2
N_QUARTILES = 4
F_DIM = 16        # f_dim (kept small for the example)
F_HIDDEN = 32     # f_hidden
N_CLASSES = 1

D1 = N_SLICES * N_SIDES * N_QUARTILES * F_DIM   # 768  (i_module in-features)
D2 = N_SLICES * N_SIDES * F_DIM                 # 192  (ii_module in-features)
H2 = 2 * F_HIDDEN                               # 64   (concat hidden width)
MERGE_LANES = 128                               # lane-padded merge weight width


def _sparcc_kernel(x1_ref, x2_ref, w1_ref, w2_ref, b1_ref, b2_ref,
                   wm1_ref, wm2_ref, bm_ref, out_ref):
    """One batch tile of the full forward pass.

    x1_ref : [TB, D1]  f32   flattened f_i rows
    x2_ref : [TB, D2]  f32   flattened f_ii rows
    w1_ref : [D1, H]   bf16  i_module weight   (resident across grid steps)
    w2_ref : [D2, H]   bf16  ii_module weight  (resident)
    b1_ref : [1, H]    f32   i_module bias
    b2_ref : [1, H]    f32   ii_module bias
    wm1_ref: [H, 128]  f32   merge weight rows 0..H-1, zero-padded to 128 lanes
    wm2_ref: [H, 128]  f32   merge weight rows H..2H-1, zero-padded
    bm_ref : [1, 1]    f32   merge bias (SMEM scalar)
    out_ref: [TB, 1]   f32   sigmoid(logit)
    """
    # bf16 cast on the VPU (hidden under the activation DMA); f32 accumulation.
    x1 = x1_ref[...].astype(jnp.bfloat16)
    x2 = x2_ref[...].astype(jnp.bfloat16)

    # Branch Linears + ReLU; Dropout = identity at eval time.
    h1 = jnp.dot(x1, w1_ref[...], preferred_element_type=jnp.float32) + b1_ref[...]
    h1 = jnp.maximum(h1, 0.0)
    h2 = jnp.dot(x2, w2_ref[...], preferred_element_type=jnp.float32) + b2_ref[...]
    h2 = jnp.maximum(h2, 0.0)

    # Merge Linear on the (idle) MXU: cat(h1,h2) @ wm == h1@wm1 + h2@wm2.
    # Merge weight is zero-padded to 128 lanes; logit lives in lane 0.
    m = (jnp.dot(h1, wm1_ref[...], preferred_element_type=jnp.float32)
         + jnp.dot(h2, wm2_ref[...], preferred_element_type=jnp.float32))
    logit = m[:, 0:1] + bm_ref[0, 0]

    # TODO(synk): output last dim is 1 (masked vst); lane-dense layout would
    # need an in-kernel transpose and output bytes are negligible here.
    out_ref[...] = jax.nn.sigmoid(logit)


def _choose_tile(b):
    """Batch tile size.

    * b (rounded up to 8) <= 512: a single tile — per-step grid overhead
      (~0.35 us) would dominate any split.
    * larger b: size the tile so the grid has >= 2 steps (both v7x TensorCores
      get work under the "parallel" axis), capped at 2048 rows so the f32
      double-buffered activations (~15 MiB) plus in-kernel temps fit VMEM on
      v5e/v6e/v7x with the explicit vmem limit set in the pallas_call.
    """
    b8 = max(8, ((b + 7) // 8) * 8)
    if b8 <= 512:
        return b8
    return min(2048, ((pl.cdiv(b8, 2) + 7) // 8) * 8)


def prepare_params(params):
    """One-time re-layout of the module parameters for the kernel."""
    wm = params["wm"]  # [2H, 1]
    wm1 = jnp.zeros((F_HIDDEN, MERGE_LANES), jnp.float32).at[:, 0].set(wm[:F_HIDDEN, 0])
    wm2 = jnp.zeros((F_HIDDEN, MERGE_LANES), jnp.float32).at[:, 0].set(wm[F_HIDDEN:, 0])
    return {
        "w1": params["w1"].astype(jnp.bfloat16),
        "w2": params["w2"].astype(jnp.bfloat16),
        "b1": params["b1"].reshape(1, F_HIDDEN).astype(jnp.float32),
        "b2": params["b2"].reshape(1, F_HIDDEN).astype(jnp.float32),
        "wm1": wm1,
        "wm2": wm2,
        "bm": params["bm"].reshape(1, 1).astype(jnp.float32),
    }


def sparcc_prediction_forward(f_i, f_ii, prepared):
    """f_i: [B, N_SLICES, N_SIDES, N_QUARTILES, F_DIM], f_ii: [B, N_SLICES, N_SIDES, F_DIM].
    Returns the sparcc score of shape [B] (n_classes == 1)."""
    b = f_i.shape[0]
    # Layout-preserving reshapes only — no concat, no dtype cast, no HBM copy.
    x1 = f_i.reshape(b, D1)
    x2 = f_ii.reshape(b, D2)

    tb = _choose_tile(b)
    bp = b
    if b < tb:
        # Tiny single-tile case only: pad a handful of rows up to the 8-row
        # sublane tile (negligible copy; zero rows are sliced off below).
        bp = tb
        x1 = jnp.pad(x1, ((0, bp - b), (0, 0)))
        x2 = jnp.pad(x2, ((0, bp - b), (0, 0)))

    grid = (pl.cdiv(bp, tb),)   # ragged final block handled by Pallas masking

    cost = pl.CostEstimate(
        flops=2 * bp * (D1 + D2) * F_HIDDEN + 2 * bp * H2 * MERGE_LANES,
        transcendentals=bp,                                   # sigmoid
        bytes_accessed=(bp * (D1 + D2) * 4                    # f32 activations
                        + (D1 + D2) * F_HIDDEN * 2            # bf16 branch weights
                        + 2 * F_HIDDEN * (MERGE_LANES + 1) * 4  # merge weights + biases
                        + bp * 4),                            # f32 output
    )

    out = pl.pallas_call(
        _sparcc_kernel,
        out_shape=jax.ShapeDtypeStruct((bp, 1), jnp.float32),
        grid=grid,
        in_specs=[
            # Activations: tiled over batch, auto double-buffered DMA.
            pl.BlockSpec((tb, D1), lambda i: (i, 0)),
            pl.BlockSpec((tb, D2), lambda i: (i, 0)),
            # Weights / biases: same block every step -> stay resident in VMEM.
            pl.BlockSpec((D1, F_HIDDEN), lambda i: (0, 0)),
            pl.BlockSpec((D2, F_HIDDEN), lambda i: (0, 0)),
            pl.BlockSpec((1, F_HIDDEN), lambda i: (0, 0)),
            pl.BlockSpec((1, F_HIDDEN), lambda i: (0, 0)),
            pl.BlockSpec((F_HIDDEN, MERGE_LANES), lambda i: (0, 0)),
            pl.BlockSpec((F_HIDDEN, MERGE_LANES), lambda i: (0, 0)),
            # Scalar merge bias in SMEM (avoids a padded (8,128) VMEM tile).
            pl.BlockSpec(memory_space=pltpu.MemorySpace.SMEM),
        ],
        out_specs=pl.BlockSpec((tb, 1), lambda i: (i, 0)),
        compiler_params=pltpu.CompilerParams(
            # TODO(synk): verify in a v7x trace that the "parallel" batch axis
            # is actually sharded across both TensorCores; switch to
            # CORE_PARALLEL if not.
            dimension_semantics=("parallel",),
            # f32 activations double-buffered at TB=2048 (~15 MiB) + in-kernel
            # temps (~6 MiB): raise the scoped VMEM limit above v5e's 16 MiB
            # default while staying well under v7x's 64 MiB physical per-TC.
            vmem_limit_bytes=48 * 1024 * 1024,
        ),
        cost_estimate=cost,
    )(x1, x2, prepared["w1"], prepared["w2"], prepared["b1"], prepared["b2"],
      prepared["wm1"], prepared["wm2"], prepared["bm"])

    # y.view(f_i.size(0)) in the PyTorch module
    return out[:b, 0]


def init_params(key):
    """Deterministic synthetic parameters (shapes from the nn.Linear definitions).
    Weights stored as [in_features, out_features]."""
    k1, k2, k3, k4, k5, k6 = jax.random.split(key, 6)
    scale = 0.02
    return {
        "w1": scale * jax.random.normal(k1, (D1, F_HIDDEN), jnp.float32),
        "b1": scale * jax.random.normal(k2, (F_HIDDEN,), jnp.float32),
        "w2": scale * jax.random.normal(k3, (D2, F_HIDDEN), jnp.float32),
        "b2": scale * jax.random.normal(k4, (F_HIDDEN,), jnp.float32),
        "wm": scale * jax.random.normal(k5, (2 * F_HIDDEN, N_CLASSES), jnp.float32),
        "bm": scale * jax.random.normal(k6, (N_CLASSES,), jnp.float32),
    }


def reference_forward(f_i, f_ii, params):
    """Pure-JAX f32 reference (eval-mode dropout = identity)."""
    b = f_i.shape[0]
    fi = f_i.reshape(b, -1)
    fii = f_ii.reshape(b, -1)
    h1 = jax.nn.relu(fi @ params["w1"] + params["b1"])
    h2 = jax.nn.relu(fii @ params["w2"] + params["b2"])
    cat = jnp.concatenate([h1, h2], axis=1)
    y = jax.nn.sigmoid(cat @ params["wm"] + params["bm"])
    return y.reshape(b)


if __name__ == "__main__":
    key = jax.random.PRNGKey(0)
    kp, ki, kii, ki2, kii2 = jax.random.split(key, 5)

    params = init_params(kp)
    prepared = prepare_params(params)

    # Small canonical check (B=2 -> single 8-row tile, tiny pad path).
    B = 2
    f_i = jax.random.normal(ki, (B, N_SLICES, N_SIDES, N_QUARTILES, F_DIM), jnp.float32)
    f_ii = jax.random.normal(kii, (B, N_SLICES, N_SIDES, F_DIM), jnp.float32)
    out = jax.block_until_ready(sparcc_prediction_forward(f_i, f_ii, prepared))
    ref = reference_forward(f_i, f_ii, params)
    assert out.shape == (B,)
    # bf16 branch matmuls vs f32 reference -> loosened tolerance.
    assert jnp.allclose(out, ref, atol=2e-2, rtol=2e-2), (out, ref)

    # Multi-step-grid check with a ragged final block (B=600 -> TB=304, grid=(2,),
    # no padding: last block's out-of-bounds rows are masked on write-back).
    B2 = 600
    f_i2 = jax.random.normal(ki2, (B2, N_SLICES, N_SIDES, N_QUARTILES, F_DIM), jnp.float32)
    f_ii2 = jax.random.normal(kii2, (B2, N_SLICES, N_SIDES, F_DIM), jnp.float32)
    out2 = jax.block_until_ready(sparcc_prediction_forward(f_i2, f_ii2, prepared))
    ref2 = reference_forward(f_i2, f_ii2, params)
    assert out2.shape == (B2,)
    assert jnp.allclose(out2, ref2, atol=2e-2, rtol=2e-2)

    print("KERNEL_OK")
</pallas_src>

<mosaic_0001>
module attributes {stable_mosaic.version = 11 : i64} {
  func.func @_sparcc_kernel(%arg0: i32, %arg1: memref<8x768xf32, #tpu.memory_space<vmem>>, %arg2: memref<8x192xf32, #tpu.memory_space<vmem>>, %arg3: memref<768x32xbf16, #tpu.memory_space<vmem>>, %arg4: memref<192x32xbf16, #tpu.memory_space<vmem>>, %arg5: memref<1x32xf32, #tpu.memory_space<vmem>>, %arg6: memref<1x32xf32, #tpu.memory_space<vmem>>, %arg7: memref<32x128xf32, #tpu.memory_space<vmem>>, %arg8: memref<32x128xf32, #tpu.memory_space<vmem>>, %arg9: memref<1x1xf32, #tpu.memory_space<smem>>, %arg10: memref<8x1xf32, #tpu.memory_space<vmem>>) attributes {dimension_semantics = [#tpu.dimension_semantics<parallel>], iteration_bounds = array<i64: 1>, scalar_prefetch = 0 : i64, scratch_operands = 0 : i64, tpu.core_type = #tpu.core_type<tc>, window_params = [{transform_indices = @transform_0, window_bounds = array<i64: 8, 768>}, {transform_indices = @transform_1, window_bounds = array<i64: 8, 192>}, {pipeline_mode = #tpu.pipeline_mode<synchronous>, transform_indices = @transform_2, window_bounds = array<i64: 768, 32>}, {pipeline_mode = #tpu.pipeline_mode<synchronous>, transform_indices = @transform_3, window_bounds = array<i64: 192, 32>}, {pipeline_mode = #tpu.pipeline_mode<synchronous>, transform_indices = @transform_4, window_bounds = array<i64: 1, 32>}, {pipeline_mode = #tpu.pipeline_mode<synchronous>, transform_indices = @transform_5, window_bounds = array<i64: 1, 32>}, {pipeline_mode = #tpu.pipeline_mode<synchronous>, transform_indices = @transform_6, window_bounds = array<i64: 32, 128>}, {pipeline_mode = #tpu.pipeline_mode<synchronous>, transform_indices = @transform_7, window_bounds = array<i64: 32, 128>}, {transform_indices = @transform_8, window_bounds = array<i64: 1, 1>}, {transform_indices = @transform_9, window_bounds = array<i64: 8, 1>}]} {
    %c0 = arith.constant 0 : index
    %c0_0 = arith.constant 0 : index
    %0 = vector.load %arg1[%c0, %c0_0] : memref<8x768xf32, #tpu.memory_space<vmem>>, vector<8x768xf32>
    %1 = arith.truncf %0 : vector<8x768xf32> to vector<8x768xbf16>
    %c0_1 = arith.constant 0 : index
    %c0_2 = arith.constant 0 : index
    %2 = vector.load %arg2[%c0_1, %c0_2] : memref<8x192xf32, #tpu.memory_space<vmem>>, vector<8x192xf32>
    %3 = arith.truncf %2 : vector<8x192xf32> to vector<8x192xbf16>
    %c0_3 = arith.constant 0 : index
    %c0_4 = arith.constant 0 : index
    %4 = vector.load %arg3[%c0_3, %c0_4] : memref<768x32xbf16, #tpu.memory_space<vmem>>, vector<768x32xbf16>
    %cst = arith.constant dense<0.000000e+00> : vector<8x32xf32>
    %5 = tpu.matmul %1, %4, %cst {dimension_numbers = #tpu.dot_dimension_numbers<[1], [0], [0], [1], [0, 0, 1, 1], [], []>} : vector<8x768xbf16>, vector<768x32xbf16>, vector<8x32xf32> -> vector<8x32xf32>
    %c0_5 = arith.constant 0 : index
    %c0_6 = arith.constant 0 : index
    %6 = vector.load %arg5[%c0_5, %c0_6] : memref<1x32xf32, #tpu.memory_space<vmem>>, vector<1x32xf32>
    %7 = vector.broadcast %6 : vector<1x32xf32> to vector<8x32xf32>
    %8 = arith.addf %5, %7 : vector<8x32xf32>
    %cst_7 = arith.constant 0.000000e+00 : f32
    %9 = vector.broadcast %cst_7 : f32 to vector<8x32xf32>
    %10 = arith.maximumf %8, %9 : vector<8x32xf32>
    %c0_8 = arith.constant 0 : index
    %c0_9 = arith.constant 0 : index
    %11 = vector.load %arg4[%c0_8, %c0_9] : memref<192x32xbf16, #tpu.memory_space<vmem>>, vector<192x32xbf16>
    %cst_10 = arith.constant dense<0.000000e+00> : vector<8x32xf32>
    %12 = tpu.matmul %3, %11, %cst_10 {dimension_numbers = #tpu.dot_dimension_numbers<[1], [0], [0], [1], [0, 0, 1, 1], [], []>} : vector<8x192xbf16>, vector<192x32xbf16>, vector<8x32xf32> -> vector<8x32xf32>
    %c0_11 = arith.constant 0 : index
    %c0_12 = arith.constant 0 : index
    %13 = vector.load %arg6[%c0_11, %c0_12] : memref<1x32xf32, #tpu.memory_space<vmem>>, vector<1x32xf32>
    %14 = vector.broadcast %13 : vector<1x32xf32> to vector<8x32xf32>
    %15 = arith.addf %12, %14 : vector<8x32xf32>
    %cst_13 = arith.constant 0.000000e+00 : f32
    %16 = vector.broadcast %cst_13 : f32 to vector<8x32xf32>
    %17 = arith.maximumf %15, %16 : vector<8x32xf32>
    %c0_14 = arith.constant 0 : index
    %c0_15 = arith.constant 0 : index
    %18 = vector.load %arg7[%c0_14, %c0_15] : memref<32x128xf32, #tpu.memory_space<vmem>>, vector<32x128xf32>
    %cst_16 = arith.constant dense<0.000000e+00> : vector<8x128xf32>
    %19 = tpu.matmul %10, %18, %cst_16 {dimension_numbers = #tpu.dot_dimension_numbers<[1], [0], [0], [1], [0, 0, 1, 1], [], []>} : vector<8x32xf32>, vector<32x128xf32>, vector<8x128xf32> -> vector<8x128xf32>
    %c0_17 = arith.constant 0 : index
    %c0_18 = arith.constant 0 : index
    %20 = vector.load %arg8[%c0_17, %c0_18] : memref<32x128xf32, #tpu.memory_space<vmem>>, vector<32x128xf32>
    %cst_19 = arith.constant dense<0.000000e+00> : vector<8x128xf32>
    %21 = tpu.matmul %17, %20, %cst_19 {dimension_numbers = #tpu.dot_dimension_numbers<[1], [0], [0], [1], [0, 0, 1, 1], [], []>} : vector<8x32xf32>, vector<32x128xf32>, vector<8x128xf32> -> vector<8x128xf32>
    %22 = arith.addf %19, %21 : vector<8x128xf32>
    %23 = vector.extract_strided_slice %22 {offsets = [0, 0], sizes = [8, 1], strides = [1, 1]} : vector<8x128xf32> to vector<8x1xf32>
    %c0_20 = arith.constant 0 : index
    %c0_21 = arith.constant 0 : index
    %24 = memref.load %arg9[%c0_20, %c0_21] : memref<1x1xf32, #tpu.memory_space<smem>>
    %25 = vector.broadcast %24 : f32 to vector<8x1xf32>
    %26 = arith.addf %23, %25 : vector<8x1xf32>
    %27 = arith.negf %26 : vector<8x1xf32>
    %28 = math.exp %27 : vector<8x1xf32>
    %cst_22 = arith.constant 1.000000e+00 : f32
    %29 = vector.broadcast %cst_22 : f32 to vector<8x1xf32>
    %30 = arith.addf %29, %28 : vector<8x1xf32>
    %31 = arith.divf %29, %30 : vector<8x1xf32>
    %c0_23 = arith.constant 0 : index
    %c0_24 = arith.constant 0 : index
    %32 = vector.load %arg10[%c0_23, %c0_24] : memref<8x1xf32, #tpu.memory_space<vmem>>, vector<8x1xf32>
    tpu.vector_store %arg10[%c0_23, %c0_24], %31 {strides = array<i32>} : memref<8x1xf32, #tpu.memory_space<vmem>>, vector<8x1xf32>,
    return
  }
  func.func @transform_0(%arg0: i32) -> (i32, i32) {
    %c0_i32 = arith.constant 0 : i32
    %c0_i32_0 = arith.constant 0 : i32
    return %arg0, %c0_i32 : i32, i32
  }
  func.func @transform_1(%arg0: i32) -> (i32, i32) {
    %c0_i32 = arith.constant 0 : i32
    %c0_i32_0 = arith.constant 0 : i32
    return %arg0, %c0_i32 : i32, i32
  }
  func.func @transform_2(%arg0: i32) -> (i32, i32) {
    %c0_i32 = arith.constant 0 : i32
    %c0_i32_0 = arith.constant 0 : i32
    %c0_i32_1 = arith.constant 0 : i32
    return %c0_i32, %c0_i32_0 : i32, i32
  }
  func.func @transform_3(%arg0: i32) -> (i32, i32) {
    %c0_i32 = arith.constant 0 : i32
    %c0_i32_0 = arith.constant 0 : i32
    %c0_i32_1 = arith.constant 0 : i32
    return %c0_i32, %c0_i32_0 : i32, i32
  }
  func.func @transform_4(%arg0: i32) -> (i32, i32) {
    %c0_i32 = arith.constant 0 : i32
    %c0_i32_0 = arith.constant 0 : i32
    %c0_i32_1 = arith.constant 0 : i32
    return %c0_i32, %c0_i32_0 : i32, i32
  }
  func.func @transform_5(%arg0: i32) -> (i32, i32) {
    %c0_i32 = arith.constant 0 : i32
    %c0_i32_0 = arith.constant 0 : i32
    %c0_i32_1 = arith.constant 0 : i32
    return %c0_i32, %c0_i32_0 : i32, i32
  }
  func.func @transform_6(%arg0: i32) -> (i32, i32) {
    %c0_i32 = arith.constant 0 : i32
    %c0_i32_0 = arith.constant 0 : i32
    %c0_i32_1 = arith.constant 0 : i32
    return %c0_i32, %c0_i32_0 : i32, i32
  }
  func.func @transform_7(%arg0: i32) -> (i32, i32) {
    %c0_i32 = arith.constant 0 : i32
    %c0_i32_0 = arith.constant 0 : i32
    %c0_i32_1 = arith.constant 0 : i32
    return %c0_i32, %c0_i32_0 : i32, i32
  }
  func.func @transform_8(%arg0: i32) -> (i32, i32) {
    %c0_i32 = arith.constant 0 : i32
    %c0_i32_0 = arith.constant 0 : i32
    %c0_i32_1 = arith.constant 0 : i32
    return %c0_i32, %c0_i32_0 : i32, i32
  }
  func.func @transform_9(%arg0: i32) -> (i32, i32) {
    %c0_i32 = arith.constant 0 : i32
    %c0_i32_0 = arith.constant 0 : i32
    return %arg0, %c0_i32 : i32, i32
  }
}

</mosaic_0001>

<bundles_post_ra>
// kernel: tpu_custom_call.1
= control target key start
LH: loop header
LB: loop body
LE: loop exit
PB: predicated region body
PF: predicated region fallthrough
CT: control target
= control target key end

     0   :  { %v1111_v41 = vmov 0   ;;  %vm665_vm0 = vcmask 523264   ;;  %vm1113_vm1 = vmmov 0   ;;  %vm718_vm2 = vcmask 261120   ;;  %s1420_s2 = inlined_call_operand.vmem [shape: bf16[768,32], index: 2, kind: input, shape index: {}]   ;;  %s1421_s0 = inlined_call_operand.vmem [shape: f32[8,768], index: 0, kind: input, shape index: {}]   ;;  %s1422_s3 = inlined_call_operand.vmem [shape: bf16[192,32], index: 3, kind: input, shape index: {}]   ;;  %s1423_s1 = inlined_call_operand.vmem [shape: f32[8,192], index: 1, kind: input, shape index: {}]   ;;  %s1424_s7 = inlined_call_operand.vmem [shape: f32[32,128], index: 7, kind: input, shape index: {}]   ;;  %s1425_s4 = inlined_call_operand.vmem [shape: f32[1,32], index: 4, kind: input, shape index: {}]   ;;  %s1426_s5 = inlined_call_operand.vmem [shape: f32[1,32], index: 5, kind: input, shape index: {}]   ;;  %s1427_s6 = inlined_call_operand.vmem [shape: f32[32,128], index: 6, kind: input, shape index: {}]   ;;  %s1428_s8 = inlined_call_operand.<no memory space> [shape: f32[1,1], index: 8, kind: input, shape index: {}]   ;;  %s1429_s9 = inlined_call_operand.vmem [shape: f32[8,1], index: 9, kind: output, shape index: {}]  }
   0x1   :  { %v1047_v0 = vld [vmem:[%s1420_s2 + $0x78] sm:$0xff]   ;;  %v1051_v4 = vld [vmem:[%s1420_s2 + $0x70] sm:$0xff]   ;;  %v1055_v8 = vld [vmem:[%s1420_s2 + $0x68] sm:$0xff]   ;;  %vm874_vm3 = vcmask 7168  }
   0x2   :  { %v1048_v1 = vld [vmem:[%s1420_s2 + $0xf8] sm:$0xff]   ;;  %946 = vmatprep.subr.bf16.mxu0 %v1047_v0  ;;  %v1052_v5 = vld [vmem:[%s1420_s2 + $0xf0] sm:$0xff]   ;;  %v1056_v9 = vld [vmem:[%s1420_s2 + $0xe8] sm:$0xff]  }
   0x3   :  { %v1049_v2 = vld [vmem:[%s1420_s2 + $0x38] sm:$0xff]   ;;  %968 = vmatprep.subr.bf16.mxu1 %v1048_v1  ;;  %v1053_v6 = vld [vmem:[%s1420_s2 + $0x30] sm:$0xff]   ;;  %v1057_v10 = vld [vmem:[%s1420_s2 + $0x28] sm:$0xff]  }
   0x4   :  { %v1050_v3 = vld [vmem:[%s1420_s2 + $0xb8] sm:$0xff]   ;;  %947 = vmatpush3.bf16.msra.mxu0 %v1049_v2  ;;  %v1054_v7 = vld [vmem:[%s1420_s2 + $0xb0] sm:$0xff]   ;;  %v1058_v11 = vld [vmem:[%s1420_s2 + $0xa8] sm:$0xff]  }
   0x5   :  { %969 = vmatpush3.bf16.msra.mxu1 %v1050_v3  ;;  %948 = vmatprep.subr.bf16.mxu0 %v1051_v4  ;;  %v1059_v12 = vld [vmem:[%s1420_s2 + $0x60] sm:$0xff]   ;;  %v1063_v16 = vld [vmem:[%s1420_s2 + $0x58] sm:$0xff]   ;;  %v1067_v20 = vld [vmem:[%s1420_s2 + $0x50] sm:$0xff]  }
   0x6   :  { %970 = vmatprep.subr.bf16.mxu1 %v1052_v5  ;;  %v1060_v13 = vld [vmem:[%s1420_s2 + $0xe0] sm:$0xff]   ;;  %v1064_v17 = vld [vmem:[%s1420_s2 + $0xd8] sm:$0xff]   ;;  %v1068_v21 = vld [vmem:[%s1420_s2 + $0xd0] sm:$0xff]  }
   0x7   :  { %v1061_v14 = vld [vmem:[%s1420_s2 + $0x20] sm:$0xff]   ;;  %v1065_v18 = vld [vmem:[%s1420_s2 + $0x18] sm:$0xff]   ;;  %v1069_v22 = vld [vmem:[%s1420_s2 + $0x10] sm:$0xff]  }
   0x8   :  { %949 = vmatpush3.bf16.msra.mxu0 %v1053_v6  ;;  %v1062_v15 = vld [vmem:[%s1420_s2 + $0xa0] sm:$0xff]   ;;  %v1066_v19 = vld [vmem:[%s1420_s2 + $0x98] sm:$0xff]   ;;  %v1070_v23 = vld [vmem:[%s1420_s2 + $0x90] sm:$0xff]  }
   0x9   :  { %971 = vmatpush3.bf16.msra.mxu1 %v1054_v7  ;;  %950 = vmatprep.subr.bf16.mxu0 %v1055_v8  ;;  %v1071_v24 = vld [vmem:[%s1420_s2 + $0x48] sm:$0xff]   ;;  %v1075_v28 = vld [vmem:[%s1420_s2 + $0x40] sm:$0xff]   ;;  %v37_v33 = vld [vmem:[%s1421_s0 + $0x18] sm:$0xff] }
   0xa   :  { %972 = vmatprep.subr.bf16.mxu1 %v1056_v9  ;;  %v1072_v25 = vld [vmem:[%s1420_s2 + $0xc8] sm:$0xff]   ;;  %v1076_v29 = vld [vmem:[%s1420_s2 + $0xc0] sm:$0xff]   ;;  %v43_v36 = vpack.c.bf16 %v37_v33, %v37_v33  ;;  %v36_v38 = vld [vmem:[%s1421_s0 + $0x10] sm:$0xff] }
   0xb   :  { %v1073_v26 = vld [vmem:[%s1420_s2 + $0x8] sm:$0xff]   ;;  %v1077_v30 = vld [vmem:[%s1420_s2] sm:$0xff]   ;;  %v42_v39 = vpack.c.bf16 %v36_v38, %v36_v38  ;;  %v1079_v40 = vld [vmem:[%s1420_s2 + $0x178] sm:$0xff]  }
   0xc   :  { %951 = vmatpush3.bf16.msra.mxu0 %v1057_v10  ;;  %v1074_v27 = vld [vmem:[%s1420_s2 + $0x88] sm:$0xff]   ;;  %v1078_v31 = vld [vmem:[%s1420_s2 + $0x80] sm:$0xff]   ;;  %513 = vmatprep.mubr.bf16.mxu1 %v43_v36  ;;  %v1080_v42 = vld [vmem:[%s1420_s2 + $0x138] sm:$0xff]  }
   0xd   :  { %973 = vmatpush3.bf16.msra.mxu1 %v1058_v11  ;;  %952 = vmatprep.subr.bf16.mxu0 %v1059_v12  ;;  %v35_v32 = vld [vmem:[%s1421_s0 + $0x8] sm:$0xff]  ;;  %v34_v34 = vld [vmem:[%s1421_s0] sm:$0xff]  ;;  %v1081_v43 = vld [vmem:[%s1422_s3 + $0x38] sm:$0xff]  }
   0xe   :  { %974 = vmatprep.subr.bf16.mxu1 %v1060_v13  ;;  %v41_v35 = vpack.c.bf16 %v35_v32, %v35_v32  ;;  %v40_v37 = vpack.c.bf16 %v34_v34, %v34_v34  ;;  %v1082_v44 = vld [vmem:[%s1420_s2 + $0x170] sm:$0xff]   ;;  %v1085_v47 = vld [vmem:[%s1420_s2 + $0x168] sm:$0xff]   ;;  %v1088_v50 = vld [vmem:[%s1420_s2 + $0x160] sm:$0xff]   ;;  %v1112_v13 = vmov 0.0  }
   0xf   :  { %v1083_v45 = vld [vmem:[%s1420_s2 + $0x130] sm:$0xff]   ;;  %v1086_v48 = vld [vmem:[%s1420_s2 + $0x128] sm:$0xff]   ;;  %v1089_v51 = vld [vmem:[%s1420_s2 + $0x120] sm:$0xff]  }
  0x10   :  { %953 = vmatpush3.bf16.msra.mxu0 %v1061_v14  ;;  %473 = vmatprep.mubr.bf16.mxu0 %v41_v35  ;;  %v1084_v46 = vld [vmem:[%s1422_s3 + $0x30] sm:$0xff]   ;;  %v1087_v49 = vld [vmem:[%s1422_s3 + $0x28] sm:$0xff]   ;;  %v1090_v52 = vld [vmem:[%s1422_s3 + $0x20] sm:$0xff]  }
  0x11   :  { %975 = vmatpush3.bf16.msra.mxu1 %v1062_v15  ;;  %954 = vmatprep.subr.bf16.mxu0 %v1063_v16  ;;  %v1091_v53 = vld [vmem:[%s1420_s2 + $0x158] sm:$0xff]   ;;  %v1094_v56 = vld [vmem:[%s1420_s2 + $0x150] sm:$0xff]   ;;  %v1097_v59 = vld [vmem:[%s1420_s2 + $0x148] sm:$0xff]  }
  0x12   :  { %976 = vmatprep.subr.bf16.mxu1 %v1064_v17  ;;  %v1092_v54 = vld [vmem:[%s1420_s2 + $0x118] sm:$0xff]   ;;  %v1095_v57 = vld [vmem:[%s1420_s2 + $0x110] sm:$0xff]   ;;  %v1098_v60 = vld [vmem:[%s1420_s2 + $0x108] sm:$0xff]  }
  0x13   :  { %v1093_v55 = vld [vmem:[%s1422_s3 + $0x18] sm:$0xff]   ;;  %v1096_v58 = vld [vmem:[%s1422_s3 + $0x10] sm:$0xff]   ;;  %v39_v61 = vld [vmem:[%s1421_s0 + $0x28] sm:$0xff] }
  0x14   :  { %955 = vmatpush3.bf16.msra.mxu0 %v1065_v18  ;;  %v1099_v62 = vld [vmem:[%s1422_s3 + $0x8] sm:$0xff]   ;;  %v45_v63 = vpack.c.bf16 %v39_v61, %v39_v61  ;;  %v1100_v0 = vld [vmem:[%s1420_s2 + $0x140] sm:$0xff]   ;;  %v1103_v7 = vld [vmem:[%s1422_s3 + $0x58] sm:$0xff]  }
  0x15   :  { %977 = vmatpush3.bf16.msra.mxu1 %v1066_v19  ;;  %956 = vmatprep.subr.bf16.mxu0 %v1067_v20  ;;  %v1101_v1 = vld [vmem:[%s1420_s2 + $0x100] sm:$0xff]   ;;  %v47_v4 = vld [vmem:[%s1423_s1 + $0x8] sm:$0xff]  ;;  %v1104_v8 = vld [vmem:[%s1422_s3 + $0x50] sm:$0xff]  }
  0x16   :  { %978 = vmatprep.subr.bf16.mxu1 %v1068_v21  ;;  %v1102_v2 = vld [vmem:[%s1422_s3] sm:$0xff]   ;;  %v49_v5 = vpack.c.bf16 %v47_v4, %v47_v4  ;;  %v1105_v9 = vld [vmem:[%s1422_s3 + $0x48] sm:$0xff]   ;;  %v717_v14 = vld [vmem:[%s1424_s7 + $0x18] sm:$0xff] }
  0x17   :  { %v38_v3 = vld [vmem:[%s1421_s0 + $0x20] sm:$0xff]  ;;  %v716_v15 = vld [vmem:[%s1424_s7 + $0x10] sm:$0xff]  ;;  %v715_v16 = vld [vmem:[%s1424_s7 + $0x8] sm:$0xff] }
  0x18   :  { %957 = vmatpush3.bf16.msra.mxu0 %v1069_v22  ;;  %v44_v6 = vpack.c.bf16 %v38_v3, %v38_v3  ;;  %v1106_v10 = vld [vmem:[%s1422_s3 + $0x40] sm:$0xff]  }
  0x19   :  { %979 = vmatpush3.bf16.msra.mxu1 %v1070_v23  ;;  %958 = vmatprep.subr.bf16.mxu0 %v1071_v24  ;;  %v46_v11 = vld [vmem:[%s1423_s1] sm:$0xff] }
  0x1a   :  { %980 = vmatprep.subr.bf16.mxu1 %v1072_v25  ;;  %v48_v12 = vpack.c.bf16 %v46_v11, %v46_v11  ;;  %v714_v17 = vld [vmem:[%s1424_s7] sm:$0xff] }
  0x1b   :  { %v929_v32 = vld [vmem:[%s1426_s5] ss:$0 sm:$0xff] }
  0x1c   :  { %959 = vmatpush3.bf16.msra.mxu0 %v1073_v26 }
  0x1d   :  { %981 = vmatpush3.bf16.msra.mxu1 %v1074_v27  ;;  %960 = vmatprep.subr.bf16.mxu0 %v1075_v28 }
  0x1e   :  { %982 = vmatprep.subr.bf16.mxu1 %v1076_v29 }
  0x20   :  { %961 = vmatpush3.bf16.msra.mxu0 %v1077_v30 }
  0x21   :  { %983 = vmatpush3.bf16.msra.mxu1 %v1078_v31  ;;  %990 = vmatprep.subr.bf16.mxu0 %v1079_v40  ;;  %v880_v31 = vld [vmem:[%s1425_s4] ss:$0 sm:$0xff]  ;;  %v713_v40 = vld [vmem:[%s1427_s6 + $0x18] sm:$0xff] }
  0x22   :  { %669 = vmatprep.subr.bf16.mxu1 %v1111_v41 }
  0x23   :  { %474 = vmatmul.mubr.bf16.vlgmr.msra.gmra.mxu0 %v40_v37 }
  0x24   :  { %514 = vmatmul.mubr.bf16.vlgmr.msra.gmra.mxu1 %v42_v39  ;;  %991 = vmatpush3.bf16.msra.mxu0 %v1080_v42 }
  0x25   :  { %670 = vmatpush1.bf16.msra.mxu1 %v1081_v43  ;;  %992 = vmatprep.subr.bf16.mxu0 %v1082_v44  ;;  %v712_v43 = vld [vmem:[%s1427_s6 + $0x10] sm:$0xff] }
  0x26   :  { %671 = vmatprep.subr.bf16.mxu1 %v1111_v41  ;;  %553 = vmatprep.mubr.bf16.mxu0 %v45_v63 }
  0x27   :  { %942 = vmatprep.mubr.msk.bf16.mxu1 %vm665_vm0, %v49_v5 }
  0x28   :  { %993 = vmatpush3.bf16.msra.mxu0 %v1083_v45 }
  0x29   :  { %672 = vmatpush1.bf16.msra.mxu1 %v1084_v46  ;;  %994 = vmatprep.subr.bf16.mxu0 %v1085_v47  ;;  %v711_v46 = vld [vmem:[%s1427_s6 + $0x8] sm:$0xff]  ;;  %v710_v47 = vld [vmem:[%s1427_s6] sm:$0xff] }
  0x2a   :  { %673 = vmatprep.subr.bf16.mxu1 %v1111_v41 }
  0x2c   :  { %995 = vmatpush3.bf16.msra.mxu0 %v1086_v48 }
  0x2d   :  { %674 = vmatpush1.bf16.msra.mxu1 %v1087_v49  ;;  %996 = vmatprep.subr.bf16.mxu0 %v1088_v50 }
  0x2e   :  { %675 = vmatprep.subr.bf16.mxu1 %v1111_v41 }
  0x30   :  { %997 = vmatpush3.bf16.msra.mxu0 %v1089_v51 }
  0x31   :  { %676 = vmatpush1.bf16.msra.mxu1 %v1090_v52  ;;  %998 = vmatprep.subr.bf16.mxu0 %v1091_v53  ;;  %v866_v52 = vstv %s1428_s8 }
  0x32   :  { %677 = vmatprep.subr.bf16.mxu1 %v1111_v41 }
  0x34   :  { %999 = vmatpush3.bf16.msra.mxu0 %v1092_v54 }
  0x35   :  { %678 = vmatpush1.bf16.msra.mxu1 %v1093_v55  ;;  %1000 = vmatprep.subr.bf16.mxu0 %v1094_v56 }
  0x36   :  { %679 = vmatprep.subr.bf16.mxu1 %v1111_v41 }
  0x38   :  { %1001 = vmatpush3.bf16.msra.mxu0 %v1095_v57 }
  0x39   :  { %680 = vmatpush1.bf16.msra.mxu1 %v1096_v58  ;;  %1002 = vmatprep.subr.bf16.mxu0 %v1097_v59 }
  0x3a   :  { %681 = vmatprep.subr.bf16.mxu1 %v1111_v41 }
  0x3c   :  { %1003 = vmatpush3.bf16.msra.mxu0 %v1098_v60 }
  0x3d   :  { %682 = vmatpush1.bf16.msra.mxu1 %v1099_v62  ;;  %1004 = vmatprep.subr.bf16.mxu0 %v1100_v0 }
  0x3e   :  { %683 = vmatprep.subr.bf16.mxu1 %v1111_v41 }
  0x40   :  { %1005 = vmatpush3.bf16.msra.mxu0 %v1101_v1 }
  0x41   :  { %684 = vmatpush1.bf16.msra.mxu1 %v1102_v2  ;;  %1022 = vmatprep.subr.mxu0 %v1112_v13 }
  0x42   :  { %693 = vmatprep.subr.bf16.mxu1 %v1111_v41 }
  0x43   :  { %554 = vmatmul.mubr.bf16.vlgmr.msra.gmra.mxu0 %v44_v6 }
  0x44   :  { %1023 = vmatpush3.msra.mxu0 %v717_v14  ;;  %1030 = vmatprep.mubr.msk.f32.mxu0 %vm1113_vm1, %v1112_v13 }
  0x45   :  { %694 = vmatpush2.bf16.msra.mxu1 %v1103_v7  ;;  %1024 = vmatprep.subr.mxu0 %v1112_v13 }
  0x46   :  { %695 = vmatprep.subr.bf16.mxu1 %v1111_v41  ;;  %1025 = vmatpush3.msra.mxu0 %v716_v15 }
  0x47   :  { %1026 = vmatprep.subr.mxu0 %v1112_v13 }
  0x48   :  { %1027 = vmatpush3.msra.mxu0 %v715_v16 }
  0x49   :  { %696 = vmatpush2.bf16.msra.mxu1 %v1104_v8  ;;  %1028 = vmatprep.subr.mxu0 %v1112_v13 }
  0x4a   :  { %697 = vmatprep.subr.bf16.mxu1 %v1111_v41  ;;  %1029 = vmatpush3.msra.mxu0 %v714_v17 }
  0x4b   :  { %1033 = vmatprep.subr.mxu0 %v1112_v13 }
  0x4d   :  { %698 = vmatpush2.bf16.msra.mxu1 %v1105_v9 }
  0x4e   :  { %699 = vmatprep.subr.bf16.mxu1 %v1111_v41 }
  0x51   :  { %700 = vmatpush2.bf16.msra.mxu1 %v1106_v10 }
  0x54   :  { %702 = vmatmul.mubr.bf16.vlgmr.msra.gmra.mxu1 %v48_v12 }
  0xe3   :  { %v962_v18 = vpop.f32.mrf.mxu0 }
  0xe4   :  { %v984_v19 = vpop.f32.mrf.mxu1 }
  0xe5   :  { %v963_v20 = vpop.f32.mrf.mxu0 }
  0xe6   :  { %v985_v21 = vpop.f32.mrf.mxu1  ;;  %v964_v30 = vadd.f32 %v963_v20, %v962_v18 }
  0xe7   :  { %v965_v23 = vpop.f32.mrf.mxu0  ;;  %v986_v37 = vadd.f32 %v985_v21, %v984_v19 }
  0xe8   :  { %v987_v22 = vpop.f32.mrf.mxu1  ;;  %v476_v34 = vadd.f32 %v964_v30, %v880_v31 }
  0xe9   :  { %v966_v25 = vpop.f32.mrf.mxu0 }
  0xea   :  { %v988_v24 = vpop.f32.mrf.mxu1  ;;  %v516_v42 = vadd.f32 %v986_v37, %v476_v34 }
 0x103   :  { %v1006_v26 = vpop.f32.mrf.mxu0 }
 0x105   :  { %v1007_v27 = vpop.f32.mrf.mxu0 }
 0x106   :  { %v1008_v38 = vadd.f32 %v1007_v27, %v1006_v26 }
 0x107   :  { %v1009_v28 = vpop.f32.mrf.mxu0 }
 0x108   :  { %v556_v45 = vadd.f32 %v1008_v38, %v516_v42 }
 0x109   :  { %v1010_v29 = vpop.f32.mrf.mxu0 }
 0x10a   :  { %v561_v48 = vmax.f32 %v556_v45, 0.0 }
 0x114   :  { %v703_v33 = vpop.f32.mrf.mxu1 }
 0x115   :  { %v704_v35 = vadd.f32 %v929_v32, %v703_v33 }
 0x116   :  { %v705_v36 = vpop.f32.mrf.mxu1 }
 0x117   :  { %v709_v39 = vmax.f32 %v704_v35, 0.0 }
 0x118   :  { %v706_v41 = vpop.f32.mrf.mxu1 }
 0x119   :  { %1031 = vmatmul.mubr.msk.f32.vlgmr.msra.gmra.mxu0 %vm718_vm2, %v709_v39 }
 0x11a   :  { %1034 = vmatpush3.msra.mxu0 %v713_v40  ;;  %v707_v44 = vpop.f32.mrf.mxu1  ;;  %1041 = vmatprep.mubr.msk.f32.mxu0 %vm1113_vm1, %v1112_v13 }
 0x11b   :  { %1035 = vmatprep.subr.mxu0 %v1112_v13 }
 0x11c   :  { %1036 = vmatpush3.msra.mxu0 %v712_v43 }
 0x11d   :  { %1037 = vmatprep.subr.mxu0 %v1112_v13 }
 0x11e   :  { %1038 = vmatpush3.msra.mxu0 %v711_v46 }
 0x11f   :  { %1039 = vmatprep.subr.mxu0 %v1112_v13 }
 0x120   :  { %1040 = vmatpush3.msra.mxu0 %v710_v47 }
 0x121   :  { %1042 = vmatmul.mubr.msk.f32.vlgmr.msra.gmra.mxu0 %vm718_vm2, %v561_v48 }
 0x1d9   :  { %v788_v49 = vpop.f32.mrf.mxu0 }
 0x1db   :  { %v1032_v50 = vpop.f32.mrf.mxu0 }
 0x1e1   :  { %v861_v51 = vpop.f32.mrf.mxu0 }
 0x1e2   :  { %v862_v53 = vadd.f32 %v861_v51, %v788_v49 }
 0x1e3   :  { %v1043_v54 = vpop.f32.mrf.mxu0 }
 0x1e4   :  { %v867_v55 = vadd.f32 %v866_v52, %v862_v53 }
 0x1e6   :  { %v945_v56 = vmul.f32 -1.442695, %v867_v55 }
 0x1e8   :  { %1107 = vpow2.f32 %v945_v56 }
 0x1f5   :  { %v1108_v57 = vpop.eup %1107 }
 0x1f6   :  { %v871_v58 = vadd.f32 1.0, %v1108_v57 }
 0x1f8   :  { %1109 = vrcp.f32 %v871_v58 }
 0x205   :  { %v1110_v59 = vpop.eup %1109 }
 0x206   :  { %875 = vst.msk [vmem:[%s1429_s9] sm:$0xff] %vm874_vm3, %v1110_v59 }

</bundles_post_ra>
